<compile_context>
chip_gen: v7x
topology: tpu7x:2x2x1
jax: 0.10.0
libtpu: 0.0.40
codegen_flags: <defaults>
</compile_context>

<pallas_src>
import functools

import jax
import jax.numpy as jnp
from jax.experimental import pallas as pl
from jax.experimental.pallas import tpu as pltpu

EPS = 1e-5


def _round_up(v, m):
    return (v + m - 1) // m * m


def _choose_block_b(batch_rounded, feat, bd_pad, itemsize=4,
                    budget_bytes=20 * 1024 * 1024, cap=1024):
    """Largest batch tile whose double-buffered working set fits the budget."""
    tb = min(cap, batch_rounded)
    while tb > 8:
        need = (2 * tb * (feat + 2 * bd_pad) + feat * bd_pad) * itemsize
        if need <= budget_bytes:
            break
        tb //= 2
    return max(tb, 8)


def _linear_stats_kernel(x_ref, w_ref, y_ref, stats_ref, sum_sc, sq_sc,
                         *, batch, block_b, needs_mask):
    i = pl.program_id(0)

    @pl.when(i == 0)
    def _():
        sum_sc[...] = jnp.zeros_like(sum_sc)
        sq_sc[...] = jnp.zeros_like(sq_sc)

    # Linear (bias dropped: a per-feature bias cancels exactly under
    # training-mode BatchNorm, so adding it is dead math).
    y = jnp.dot(x_ref[...], w_ref[...], preferred_element_type=jnp.float32)
    y_ref[...] = y

    if needs_mask:  # zero padded batch rows out of the statistics
        row = i * block_b + jax.lax.broadcasted_iota(jnp.int32, (block_b, 1), 0)
        y = jnp.where(row < batch, y, 0.0)

    # Single-pass stats: E[y^2] - E[y]^2, kept in f32 scratch.
    sum_sc[...] += jnp.sum(y, axis=0, keepdims=True)
    sq_sc[...] += jnp.sum(y * y, axis=0, keepdims=True)

    @pl.when(i == pl.num_programs(0) - 1)
    def _():
        inv_b = jnp.float32(1.0 / batch)
        mean = sum_sc[...] * inv_b
        var = jnp.maximum(sq_sc[...] * inv_b - mean * mean, 0.0)
        stats_ref[0:1, :] = mean
        stats_ref[1:2, :] = jax.lax.rsqrt(var + EPS)


def _bn_apply_kernel(y_ref, stats_ref, gamma_ref, beta_ref, o_ref):
    mean = stats_ref[0:1, :]
    rstd = stats_ref[1:2, :]
    xhat = (y_ref[...] - mean) * rstd
    o_ref[...] = (gamma_ref[...] * xhat + beta_ref[...]).astype(o_ref.dtype)


def feat_bottleneck(x, w, b, gamma, beta, *, max_block_b=1024):
    """x: (B, F); w: (Bd, F) as in nn.Linear; b, gamma, beta: (Bd,)."""
    del b  # cancels exactly under training-mode BatchNorm (kept for API parity)
    batch, feat = x.shape
    bd = w.shape[0]
    out_dtype = x.dtype

    # Lane-dense output/N dimension: pad bottleneck dim to a multiple of 128 so
    # stores are unmasked vst and MXU columns are not wasted.
    bd_pad = _round_up(bd, 128)

    block_b = _choose_block_b(_round_up(batch, 8), feat, bd_pad,
                              cap=max_block_b)
    batch_pad = _round_up(batch, block_b)
    grid_b = batch_pad // block_b

    # Parameter prep (constant-folds under jit when params are constants).
    # NOTE: x/w could be fed as bf16 to halve HBM traffic; kept f32 here to
    # stay within the 1e-4 tolerance vs the f32 reference.
    w_t = jnp.zeros((feat, bd_pad), jnp.float32).at[:, :bd].set(
        w.T.astype(jnp.float32))
    g2 = jnp.zeros((1, bd_pad), jnp.float32).at[0, :bd].set(
        gamma.astype(jnp.float32))
    be2 = jnp.zeros((1, bd_pad), jnp.float32).at[0, :bd].set(
        beta.astype(jnp.float32))

    x_p = x.astype(jnp.float32)
    if batch_pad != batch:
        x_p = jnp.pad(x_p, ((0, batch_pad - batch), (0, 0)))

    # Explicit scoped-VMEM limit (default is well below physical); stays under
    # v7x's 64 MiB physical VMEM.
    vmem_need = (2 * block_b * (feat + 2 * bd_pad) + feat * bd_pad
                 + 6 * bd_pad) * 4
    vmem_limit = int(min(max(2 * vmem_need, 32 * 1024 * 1024),
                         48 * 1024 * 1024))

    # ---- Pass 1: tiled matmul + batch-stat accumulation ------------------
    kern1 = functools.partial(_linear_stats_kernel, batch=batch,
                              block_b=block_b,
                              needs_mask=(batch_pad != batch))
    y, stats = pl.pallas_call(
        kern1,
        out_shape=(jax.ShapeDtypeStruct((batch_pad, bd_pad), jnp.float32),
                   jax.ShapeDtypeStruct((2, bd_pad), jnp.float32)),
        grid=(grid_b,),
        in_specs=[
            pl.BlockSpec((block_b, feat), lambda i: (i, 0)),
            pl.BlockSpec((feat, bd_pad), lambda i: (0, 0)),
        ],
        out_specs=(
            pl.BlockSpec((block_b, bd_pad), lambda i: (i, 0)),
            pl.BlockSpec((2, bd_pad), lambda i: (0, 0)),
        ),
        scratch_shapes=[pltpu.VMEM((1, bd_pad), jnp.float32),
                        pltpu.VMEM((1, bd_pad), jnp.float32)],
        compiler_params=pltpu.CompilerParams(
            dimension_semantics=("arbitrary",),
            vmem_limit_bytes=vmem_limit),
        cost_estimate=pl.CostEstimate(
            flops=2 * batch_pad * feat * bd_pad,
            transcendentals=0,
            bytes_accessed=4 * (batch_pad * feat + feat * bd_pad
                                + batch_pad * bd_pad)),
    )(x_p, w_t)

    # ---- Pass 2: normalize + affine (embarrassingly parallel over batch) --
    out = pl.pallas_call(
        _bn_apply_kernel,
        out_shape=jax.ShapeDtypeStruct((batch_pad, bd_pad), out_dtype),
        grid=(grid_b,),
        in_specs=[
            pl.BlockSpec((block_b, bd_pad), lambda i: (i, 0)),
            pl.BlockSpec((2, bd_pad), lambda i: (0, 0)),
            pl.BlockSpec((1, bd_pad), lambda i: (0, 0)),
            pl.BlockSpec((1, bd_pad), lambda i: (0, 0)),
        ],
        out_specs=pl.BlockSpec((block_b, bd_pad), lambda i: (i, 0)),
        compiler_params=pltpu.CompilerParams(
            dimension_semantics=("parallel",),   # megacore on v7x
            vmem_limit_bytes=vmem_limit),
        cost_estimate=pl.CostEstimate(
            flops=4 * batch_pad * bd_pad,
            transcendentals=0,
            bytes_accessed=4 * 2 * batch_pad * bd_pad),
    )(y, stats, g2, be2)

    return out[:batch, :bd]


def _reference(x, w, b, gamma, beta):
    y = x.astype(jnp.float32) @ w.T.astype(jnp.float32) + b
    mean = y.mean(axis=0, keepdims=True)
    var = ((y - mean) ** 2).mean(axis=0, keepdims=True)
    return gamma * (y - mean) / jnp.sqrt(var + EPS) + beta


if __name__ == "__main__":
    key = jax.random.PRNGKey(0)
    k_x, k_w, k_bn = jax.random.split(key, 3)

    batch = 8
    feature_dim = 32
    bottleneck_dim = 16

    # Deterministic parameter init mirroring init_weights():
    #   Linear: xavier_normal_ weight, zero bias
    #   BatchNorm1d: weight ~ N(1.0, 0.02), zero bias
    xavier_std = (2.0 / (feature_dim + bottleneck_dim)) ** 0.5
    w = xavier_std * jax.random.normal(
        k_w, (bottleneck_dim, feature_dim), dtype=jnp.float32)
    b = jnp.zeros((bottleneck_dim,), dtype=jnp.float32)
    gamma = 1.0 + 0.02 * jax.random.normal(
        k_bn, (bottleneck_dim,), dtype=jnp.float32)
    beta = jnp.zeros((bottleneck_dim,), dtype=jnp.float32)

    x = jax.random.normal(k_x, (batch, feature_dim), dtype=jnp.float32)

    out = feat_bottleneck(x, w, b, gamma, beta)
    out = jax.block_until_ready(out)

    ref = _reference(x, w, b, gamma, beta)
    assert out.shape == (batch, bottleneck_dim)
    assert jnp.allclose(out, ref, atol=1e-4, rtol=1e-4)

    print("KERNEL_OK")
</pallas_src>

<mosaic_0001>
module attributes {stable_mosaic.version = 11 : i64} {
  func.func @_linear_stats_kernel(%arg0: i32, %arg1: memref<8x32xf32, #tpu.memory_space<vmem>>, %arg2: memref<32x128xf32, #tpu.memory_space<vmem>>, %arg3: memref<8x128xf32, #tpu.memory_space<vmem>>, %arg4: memref<2x128xf32, #tpu.memory_space<vmem>>, %arg5: memref<1x128xf32, #tpu.memory_space<vmem>>, %arg6: memref<1x128xf32, #tpu.memory_space<vmem>>) attributes {dimension_semantics = [#tpu.dimension_semantics<arbitrary>], iteration_bounds = array<i64: 1>, scalar_prefetch = 0 : i64, scratch_operands = 2 : i64, tpu.core_type = #tpu.core_type<tc>, window_params = [{transform_indices = @transform_0, window_bounds = array<i64: 8, 32>}, {pipeline_mode = #tpu.pipeline_mode<synchronous>, transform_indices = @transform_1, window_bounds = array<i64: 32, 128>}, {transform_indices = @transform_2, window_bounds = array<i64: 8, 128>}, {pipeline_mode = #tpu.pipeline_mode<synchronous>, transform_indices = @transform_3, window_bounds = array<i64: 2, 128>}]} {
    %c0_i32 = arith.constant 0 : i32
    %0 = arith.cmpi eq, %arg0, %c0_i32 : i32
    %1 = arith.extui %0 : i1 to i32
    %c0_i32_0 = arith.constant 0 : i32
    %2 = arith.cmpi ne, %1, %c0_i32_0 : i32
    scf.if %2 {
      %cst_18 = arith.constant 0.000000e+00 : f32
      %21 = vector.broadcast %cst_18 : f32 to vector<1x128xf32>
      %c0_19 = arith.constant 0 : index
      %c0_20 = arith.constant 0 : index
      %22 = vector.load %arg5[%c0_19, %c0_20] : memref<1x128xf32, #tpu.memory_space<vmem>>, vector<1x128xf32>
      tpu.vector_store %arg5[%c0_19, %c0_20], %21 {strides = array<i32>} : memref<1x128xf32, #tpu.memory_space<vmem>>, vector<1x128xf32>,
      %cst_21 = arith.constant 0.000000e+00 : f32
      %23 = vector.broadcast %cst_21 : f32 to vector<1x128xf32>
      %c0_22 = arith.constant 0 : index
      %c0_23 = arith.constant 0 : index
      %24 = vector.load %arg6[%c0_22, %c0_23] : memref<1x128xf32, #tpu.memory_space<vmem>>, vector<1x128xf32>
      tpu.vector_store %arg6[%c0_22, %c0_23], %23 {strides = array<i32>} : memref<1x128xf32, #tpu.memory_space<vmem>>, vector<1x128xf32>,
    } else {
    }
    %c0 = arith.constant 0 : index
    %c0_1 = arith.constant 0 : index
    %3 = vector.load %arg1[%c0, %c0_1] : memref<8x32xf32, #tpu.memory_space<vmem>>, vector<8x32xf32>
    %c0_2 = arith.constant 0 : index
    %c0_3 = arith.constant 0 : index
    %4 = vector.load %arg2[%c0_2, %c0_3] : memref<32x128xf32, #tpu.memory_space<vmem>>, vector<32x128xf32>
    %cst = arith.constant dense<0.000000e+00> : vector<8x128xf32>
    %5 = tpu.matmul %3, %4, %cst {dimension_numbers = #tpu.dot_dimension_numbers<[1], [0], [0], [1], [0, 0, 1, 1], [], []>} : vector<8x32xf32>, vector<32x128xf32>, vector<8x128xf32> -> vector<8x128xf32>
    %c0_4 = arith.constant 0 : index
    %c0_5 = arith.constant 0 : index
    %6 = vector.load %arg3[%c0_4, %c0_5] : memref<8x128xf32, #tpu.memory_space<vmem>>, vector<8x128xf32>
    tpu.vector_store %arg3[%c0_4, %c0_5], %5 {strides = array<i32>} : memref<8x128xf32, #tpu.memory_space<vmem>>, vector<8x128xf32>,
    %c0_6 = arith.constant 0 : index
    %c0_7 = arith.constant 0 : index
    %7 = vector.load %arg5[%c0_6, %c0_7] : memref<1x128xf32, #tpu.memory_space<vmem>>, vector<1x128xf32>
    %cst_8 = arith.constant dense<0.000000e+00> : vector<128xf32>
    %8 = vector.multi_reduction <add>, %5, %cst_8 [0] : vector<8x128xf32> to vector<128xf32>
    %9 = vector.shape_cast %8 : vector<128xf32> to vector<1x128xf32>
    %10 = arith.addf %7, %9 : vector<1x128xf32>
    %c0_9 = arith.constant 0 : index
    %c0_10 = arith.constant 0 : index
    %11 = vector.load %arg5[%c0_9, %c0_10] : memref<1x128xf32, #tpu.memory_space<vmem>>, vector<1x128xf32>
    tpu.vector_store %arg5[%c0_9, %c0_10], %10 {strides = array<i32>} : memref<1x128xf32, #tpu.memory_space<vmem>>, vector<1x128xf32>,
    %c0_11 = arith.constant 0 : index
    %c0_12 = arith.constant 0 : index
    %12 = vector.load %arg6[%c0_11, %c0_12] : memref<1x128xf32, #tpu.memory_space<vmem>>, vector<1x128xf32>
    %13 = arith.mulf %5, %5 : vector<8x128xf32>
    %cst_13 = arith.constant dense<0.000000e+00> : vector<128xf32>
    %14 = vector.multi_reduction <add>, %13, %cst_13 [0] : vector<8x128xf32> to vector<128xf32>
    %15 = vector.shape_cast %14 : vector<128xf32> to vector<1x128xf32>
    %16 = arith.addf %12, %15 : vector<1x128xf32>
    %c0_14 = arith.constant 0 : index
    %c0_15 = arith.constant 0 : index
    %17 = vector.load %arg6[%c0_14, %c0_15] : memref<1x128xf32, #tpu.memory_space<vmem>>, vector<1x128xf32>
    tpu.vector_store %arg6[%c0_14, %c0_15], %16 {strides = array<i32>} : memref<1x128xf32, #tpu.memory_space<vmem>>, vector<1x128xf32>,
    %c0_i32_16 = arith.constant 0 : i32
    %18 = arith.cmpi eq, %arg0, %c0_i32_16 : i32
    %19 = arith.extui %18 : i1 to i32
    %c0_i32_17 = arith.constant 0 : i32
    %20 = arith.cmpi ne, %19, %c0_i32_17 : i32
    scf.if %20 {
      %c0_18 = arith.constant 0 : index
      %c0_19 = arith.constant 0 : index
      %21 = vector.load %arg5[%c0_18, %c0_19] : memref<1x128xf32, #tpu.memory_space<vmem>>, vector<1x128xf32>
      %cst_20 = arith.constant 1.250000e-01 : f32
      %22 = vector.broadcast %cst_20 : f32 to vector<1x128xf32>
      %23 = arith.mulf %21, %22 : vector<1x128xf32>
      %c0_21 = arith.constant 0 : index
      %c0_22 = arith.constant 0 : index
      %24 = vector.load %arg6[%c0_21, %c0_22] : memref<1x128xf32, #tpu.memory_space<vmem>>, vector<1x128xf32>
      %cst_23 = arith.constant 1.250000e-01 : f32
      %25 = vector.broadcast %cst_23 : f32 to vector<1x128xf32>
      %26 = arith.mulf %24, %25 : vector<1x128xf32>
      %27 = arith.mulf %23, %23 : vector<1x128xf32>
      %28 = arith.subf %26, %27 : vector<1x128xf32>
      %cst_24 = arith.constant 0.000000e+00 : f32
      %29 = vector.broadcast %cst_24 : f32 to vector<1x128xf32>
      %30 = arith.maximumf %28, %29 : vector<1x128xf32>
      %c0_25 = arith.constant 0 : index
      %c0_26 = arith.constant 0 : index
      %31 = vector.load %arg4[%c0_25, %c0_26] : memref<2x128xf32, #tpu.memory_space<vmem>>, vector<1x128xf32>
      tpu.vector_store %arg4[%c0_25, %c0_26], %23 {strides = array<i32>} : memref<2x128xf32, #tpu.memory_space<vmem>>, vector<1x128xf32>,
      %cst_27 = arith.constant 9.99999974E-6 : f32
      %32 = vector.broadcast %cst_27 : f32 to vector<1x128xf32>
      %33 = arith.addf %30, %32 : vector<1x128xf32>
      %34 = math.rsqrt %33 : vector<1x128xf32>
      %c1 = arith.constant 1 : index
      %c0_28 = arith.constant 0 : index
      %35 = vector.load %arg4[%c1, %c0_28] : memref<2x128xf32, #tpu.memory_space<vmem>>, vector<1x128xf32>
      tpu.vector_store %arg4[%c1, %c0_28], %34 {strides = array<i32>} : memref<2x128xf32, #tpu.memory_space<vmem>>, vector<1x128xf32>,
    } else {
    }
    return
  }
  func.func @transform_0(%arg0: i32) -> (i32, i32) {
    %c0_i32 = arith.constant 0 : i32
    %c0_i32_0 = arith.constant 0 : i32
    return %arg0, %c0_i32 : i32, i32
  }
  func.func @transform_1(%arg0: i32) -> (i32, i32) {
    %c0_i32 = arith.constant 0 : i32
    %c0_i32_0 = arith.constant 0 : i32
    %c0_i32_1 = arith.constant 0 : i32
    return %c0_i32, %c0_i32_0 : i32, i32
  }
  func.func @transform_2(%arg0: i32) -> (i32, i32) {
    %c0_i32 = arith.constant 0 : i32
    %c0_i32_0 = arith.constant 0 : i32
    return %arg0, %c0_i32 : i32, i32
  }
  func.func @transform_3(%arg0: i32) -> (i32, i32) {
    %c0_i32 = arith.constant 0 : i32
    %c0_i32_0 = arith.constant 0 : i32
    %c0_i32_1 = arith.constant 0 : i32
    return %c0_i32, %c0_i32_0 : i32, i32
  }
}

</mosaic_0001>

<bundles_post_ra>
// kernel: tpu_custom_call.1
= control target key start
LH: loop header
LB: loop body
LE: loop exit
PB: predicated region body
PF: predicated region fallthrough
CT: control target
= control target key end

     0   :  { %9 = vsyncpa [#allocation5], 0  ;;  %s404_s0 = inlined_call_operand.hbm [shape: f32[8,32], index: 0, kind: input, shape index: {}]   ;;  %s405_s1 = inlined_call_operand.hbm [shape: f32[32,128], index: 1, kind: input, shape index: {}]   ;;  %s406_s2 = inlined_call_operand.hbm [shape: f32[8,128], index: 2, kind: output, shape index: {0}]   ;;  %s407_s3 = inlined_call_operand.hbm [shape: f32[2,128], index: 3, kind: output, shape index: {1}]  }
   0x1   :  { %10 = vsyncpa [#allocation8], 0 }
   0x2   :  { %11 = vsyncpa [#allocation6], 0 }
   0x3   :  { %12 = vsyncpa [#allocation11], 0  ;;  %s320_s12 = smov [#allocation4]   ;;  %s321_s14 = smov [#allocation7]  }
   0x4   :  { %s19_s13 = sshll.u32 %s320_s12, 4  ;;  %s28_s15 = sshll.u32 %s321_s14, 4  ;;  %s20_s13 = int_to_ptr.vmem [resolvable:$true] %s19_s13  ;;  %s349_s15 = int_to_ptr.vmem [resolvable:$true] %s28_s15 }
   0x5   :  { %s224_s18 = scalar_lea.hbm %s404_s0, 128 }
   0x6   :  { %p225_p0 = scmp.ne.s32.totalorder %s404_s0, %s224_s18  ;;  %p228_p1 = scmp.lt.u32.totalorder %s224_s18, %s404_s0 }
   0x8   :  { %p230_p2 = pnand %p228_p1, %p225_p0 }
   0xa   :  { %233 = shalt.err (!%p230_p2)
}
   0xb   :  { %s234_s23 = scalar_lea.vmem %s20_s13, 128  ;;  %p239_p4 = scmp.lt.s32.totalorder %s20_s13, %s20_s13 }
   0xc   :  { %p235_p3 = scmp.ne.s32.totalorder %s20_s13, %s234_s23  ;;  %p240_p5 = scmp.lt.s32.totalorder %s234_s23, %s234_s23 }
   0xe   :  { %p241_p6 = por %p240_p5, %p239_p4 }
  0x10   :  { %p242_p7 = pnand %p241_p6, %p235_p3 }
  0x12   :  { %245 = shalt.err (!%p242_p7)
}
  0x13   :  { %22 = dma.hbm_to_vmem [thread:$0]  %s404_s0, 128, %s20_s13, [#allocation5]  }
  0x14   :  { %s246_s28 = scalar_lea.hbm %s405_s1, 512 }
  0x15   :  { %p247_p8 = scmp.ne.s32.totalorder %s405_s1, %s246_s28  ;;  %p250_p9 = scmp.lt.u32.totalorder %s246_s28, %s405_s1 }
  0x17   :  { %p252_p10 = pnand %p250_p9, %p247_p8 }
  0x19   :  { %255 = shalt.err (!%p252_p10)
}
  0x1a   :  { %s256_s6 = scalar_lea.vmem %s349_s15, 512  ;;  %p261_p12 = scmp.lt.s32.totalorder %s349_s15, %s349_s15 }
  0x1b   :  { %p257_p11 = scmp.ne.s32.totalorder %s349_s15, %s256_s6  ;;  %p262_p13 = scmp.lt.s32.totalorder %s256_s6, %s256_s6 }
  0x1d   :  { %p263_p0 = por %p262_p13, %p261_p12 }
  0x1f   :  { %p264_p1 = pnand %p263_p0, %p257_p11 }
  0x21   :  { %267 = shalt.err (!%p264_p1)
}
  0x22   :  { %s322_s0 = smov 128   ;;  %s323_s7 = smov 8  }
  0x23   :  { %34 = dma.hbm_to_vmem [thread:$0]  %s405_s1, 512, %s349_s15, [#allocation8], %s322_s0, %s322_s0, %s323_s7  }
  0x24   :  { %312 = dma.done.wait [#allocation5], 128  }
  0x25   :  { %313 = vsyncadd [#allocation5], 4294967168 }
  0x26   :  { %314 = dma.done.wait [#allocation8], 512  }
  0x27   :  { %315 = vsyncadd [#allocation8], 4294966784  ;;  %v324_v0 = vmov 0.0|0.0   ;;  %v325_v1 = vmov 0.0   ;;  %vm326_vm0 = vmmov 0   ;;  %v48_v2 = vld [vmem:[#allocation7] sm:$0xff] }
  0x28   :  { %207 = vmatprep.subr.bf16.mxu0 %v324_v0  ;;  %45 = vst [vmem:[#allocation2] sm:$0x1] %v325_v1  ;;  %46 = vst [vmem:[#allocation3] sm:$0x1] %v325_v1  ;;  %204 = vmatprep.mubr.msk.f32.mxu0 %vm326_vm0, %v325_v1  ;;  %v49_v3 = vld [vmem:[#allocation7 + $0x8] sm:$0xff]  ;;  %v50_v4 = vld [vmem:[#allocation7 + $0x10] sm:$0xff] }
  0x29   :  { %v208_v5 = vpack.c.bf16 %v49_v3, %v48_v2  ;;  %v51_v6 = vld [vmem:[#allocation7 + $0x18] sm:$0xff]  ;;  %vm52_vm1 = vcmask 261120   ;;  %s327_s1 = smov [#allocation9]  }
  0x2a   :  { %v211_v7 = vpack.c.bf16 %v51_v6, %v50_v4  ;;  %v47_v8 = vld [vmem:[#allocation4] sm:$0xff]  ;;  %s166_s10 = sshll.u32 %s327_s1, 4  ;;  %s167_s10 = int_to_ptr.vmem [resolvable:$true] %s166_s10 }
  0x2b   :  { %209 = vmatpush3.bf16.msra.mxu0 %v208_v5  ;;  %s268_s11 = scalar_lea.vmem %s167_s10, 128  ;;  %p273_p3 = scmp.lt.s32.totalorder %s167_s10, %s167_s10 }
  0x2c   :  { %210 = vmatprep.subr.bf16.mxu0 %v324_v0  ;;  %p269_p2 = scmp.ne.s32.totalorder %s167_s10, %s268_s11  ;;  %p274_p4 = scmp.lt.s32.totalorder %s268_s11, %s268_s11 }
  0x2e   :  { %p275_p5 = por %p274_p4, %p273_p3 }
  0x2f   :  { %212 = vmatpush3.bf16.msra.mxu0 %v211_v7 }
  0x30   :  { %p276_p6 = pnand %p275_p5, %p269_p2 }
  0x32   :  { %205 = vmatmul.mubr.msk.f32.vlgmr.msra.gmra.mrb[0].mxu0 %vm52_vm1, %v47_v8 }
 0x105   :  { %v122_v9 = vpop.f32.mrb[0].mxu0 }
 0x106   :  { %v128_v10 = vrot.slane %v122_v9, 4  ;;  %v137_v11 = vmul.f32 %v122_v9, %v122_v9  ;;  %126 = vst [vmem:[#allocation9] sm:$0xff] %v122_v9  ;;  %v206_v12 = vpop.f32.mrb[1].mxu0 }
 0x107   :  { %279 = shalt.err (!%p276_p6)
}
 0x108   :  { %s280_s14 = scalar_lea.hbm %s406_s2, 128 }
 0x109   :  { %p281_p7 = scmp.ne.s32.totalorder %s406_s2, %s280_s14  ;;  %p284_p8 = scmp.lt.u32.totalorder %s280_s14, %s406_s2 }
 0x10b   :  { %p286_p9 = pnand %p284_p8, %p281_p7 }
 0x10d   :  { %289 = shalt.err (!%p286_p9)
}
 0x10e   :  { %169 = dma.vmem_to_hbm [thread:$0]  %s167_s10, 128, %s406_s2, [#allocation6]   ;;  %v129_v13 = vadd.f32 %v128_v10, %v122_v9  ;;  %v138_v14 = vrot.slane %v137_v11, 4  ;;  %v127_v21 = vld [vmem:[#allocation2] sm:$0x1] }
 0x10f   :  { %v136_v24 = vld [vmem:[#allocation3] sm:$0x1]  ;;  %s328_s2 = smov [#allocation10]  }
 0x110   :  { %v130_v15 = vrot.slane %v129_v13, 2  ;;  %v139_v16 = vadd.f32 %v138_v14, %v137_v11  ;;  %s176_s21 = sshll.u32 %s328_s2, 4  ;;  %s177_s21 = int_to_ptr.vmem [resolvable:$true] %s176_s21 }
 0x111   :  { %s290_s22 = scalar_lea.vmem %s177_s21, 32  ;;  %p295_p11 = scmp.lt.s32.totalorder %s177_s21, %s177_s21 }
 0x112   :  { %v131_v17 = vadd.f32 %v130_v15, %v129_v13  ;;  %v140_v18 = vrot.slane %v139_v16, 2  ;;  %p291_p10 = scmp.ne.s32.totalorder %s177_s21, %s290_s22  ;;  %p296_p12 = scmp.lt.s32.totalorder %s290_s22, %s290_s22 }
 0x114   :  { %v132_v19 = vrot.slane %v131_v17, 1  ;;  %v141_v20 = vadd.f32 %v140_v18, %v139_v16  ;;  %p297_p13 = por %p296_p12, %p295_p11 }
 0x116   :  { %v133_v22 = vadd.f32 %v132_v19, %v131_v17  ;;  %v142_v23 = vrot.slane %v141_v20, 1  ;;  %p298_p0 = pnand %p297_p13, %p291_p10 }
 0x118   :  { %v134_v25 = vadd.f32 %v133_v22, %v127_v21  ;;  %v143_v26 = vadd.f32 %v142_v23, %v141_v20 }
 0x11a   :  { %135 = vst [vmem:[#allocation2] sm:$0x1] %v134_v25  ;;  %v144_v27 = vadd.f32 %v143_v26, %v136_v24 }
 0x11c   :  { %145 = vst [vmem:[#allocation3] sm:$0x1] %v144_v27 }
 0x121   :  { %v149_v28 = vld [vmem:[#allocation2] sm:$0x1] }
 0x122   :  { %v150_v29 = vmul.f32 0.125, %v149_v28 }
 0x123   :  { %v151_v30 = vld [vmem:[#allocation3] sm:$0x1] }
 0x124   :  { %v152_v31 = vmul.f32 0.125, %v151_v30  ;;  %v153_v32 = vmul.f32 %v150_v29, %v150_v29  ;;  %156 = vst [vmem:[#allocation10] sm:$0x1] %v150_v29 }
 0x126   :  { %v154_v33 = vsub.f32 %v152_v31, %v153_v32 }
 0x128   :  { %v155_v34 = vmax.f32 %v154_v33, 0.0 }
 0x12a   :  { %v157_v35 = vadd.f32 1e-05, %v155_v34 }
 0x12c   :  { %222 = vrsqrt.f32 %v157_v35 }
 0x136   :  { %v223_v36 = vpop.eup %222 }
 0x137   :  { %159 = vst [vmem:[#allocation10 + $0x1] sm:$0x1] %v223_v36 }
 0x138   :  { %301 = shalt.err (!%p298_p0)
}
 0x139   :  { %s302_s25 = scalar_lea.hbm %s407_s3, 32 }
 0x13a   :  { %p303_p1 = scmp.ne.s32.totalorder %s407_s3, %s302_s25  ;;  %p306_p2 = scmp.lt.u32.totalorder %s302_s25, %s407_s3 }
 0x13c   :  { %p308_p3 = pnand %p306_p2, %p303_p1 }
 0x13e   :  { %311 = shalt.err (!%p308_p3)
}
 0x13f   :  { %179 = dma.vmem_to_hbm [thread:$0]  %s177_s21, 32, %s407_s3, [#allocation11]  }
 0x140   :  { %316 = dma.done.wait [#allocation6], 128  }
 0x141   :  { %317 = vsyncadd [#allocation6], 4294967168 }
 0x142   :  { %318 = dma.done.wait [#allocation11], 32  }
 0x143   :  { %319 = vsyncadd [#allocation11], 4294967264 }
 0x144   :  { %186 = vsyncpa [#allocation5], 1 }
 0x145   :  { %187 = vsyncpa [#allocation8], 1 }
 0x146   :  { %188 = vsyncpa [#allocation6], 1 }
 0x147   :  { %189 = vsyncpa [#allocation11], 1 }

</bundles_post_ra>
